<compile_context>
chip_gen: v7x
topology: tpu7x:2x2x1
jax: 0.10.0
libtpu: 0.0.40
codegen_flags: <defaults>
</compile_context>

<pallas_src>
import functools
import math

import jax
import jax.numpy as jnp
from jax import lax
from jax.experimental import pallas as pl
from jax.experimental.pallas import tpu as pltpu

# Finite stand-in for -inf so (m_prev - m_new) never produces inf - inf = NaN
# when a whole key-tile is masked out.
_NEG_INF = -1e30


def _sdpa_flash_kernel(q_ref, k_ref, v_ref, m_ref, o_ref,
                       m_sc, l_sc, acc_sc, *, scale):
    # q_ref: (1, Hb, tq, D)   k_ref/v_ref: (1, Hb, tk, D)
    # m_ref: (1, Hm_blk, tq, tk)   o_ref: (1, Hb, tq, D)
    ki = pl.program_id(3)

    @pl.when(ki == 0)
    def _():
        m_sc[...] = jnp.full(m_sc.shape, _NEG_INF, dtype=m_sc.dtype)
        l_sc[...] = jnp.zeros(l_sc.shape, dtype=l_sc.dtype)
        acc_sc[...] = jnp.zeros(acc_sc.shape, dtype=acc_sc.dtype)

    q = q_ref[0] * scale                 # (Hb, tq, D) pre-scaled
    k = k_ref[0]                         # (Hb, tk, D)
    v = v_ref[0]                         # (Hb, tk, D)
    bias = m_ref[0].astype(jnp.float32)  # (Hm_blk, tq, tk), broadcasts over Hb

    # scores = q @ k^T  (batched over heads, contract D; MXU-native, no
    # materialized transpose), f32 accumulate.
    s = lax.dot_general(q, k, (((2,), (2,)), ((0,), (0,))),
                        preferred_element_type=jnp.float32)
    s = s + bias                         # (Hb, tq, tk)

    # online softmax update
    m_prev = m_sc[...]                                        # (Hb, tq, 1)
    m_new = jnp.maximum(m_prev, jnp.max(s, axis=-1, keepdims=True))
    alpha = jnp.exp(m_prev - m_new)
    p = jnp.exp(s - m_new)                                    # (Hb, tq, tk)
    l_sc[...] = alpha * l_sc[...] + jnp.sum(p, axis=-1, keepdims=True)

    pv = lax.dot_general(p.astype(v.dtype), v, (((2,), (1,)), ((0,), (0,))),
                         preferred_element_type=jnp.float32)  # (Hb, tq, D)
    acc_sc[...] = alpha * acc_sc[...] + pv
    m_sc[...] = m_new

    # dropout_rate = 0.0 -> nn.Dropout is a no-op.
    # TODO(synk): add pltpu.prng_random_bits-based dropout if dropout_rate > 0

    @pl.when(ki == pl.num_programs(3) - 1)
    def _():
        # Single exact divide per output row at finalize (keeps tight accuracy;
        # fully-masked rows give 0/0 = NaN, matching torch.softmax semantics).
        o_ref[0] = (acc_sc[...] / l_sc[...]).astype(o_ref.dtype)


def _pick_tile(dim, cap, align):
    """Largest legal tile <= cap: full dim is always legal, else a divisor of
    dim that is a multiple of `align` (the (8,128) layout rule)."""
    if dim <= cap:
        return dim
    t = (cap // align) * align
    while t >= align:
        if dim % t == 0:
            return t
        t -= align
    return dim


def scaled_dot_product_attention(query, key, value, attn_mask):
    """query:[B,H,Sq,D]  key/value:[B,H,Sk,D]  attn_mask: additive, broadcastable."""
    B, H, Sq, D = query.shape
    Sk = key.shape[2]

    # Keep broadcast (size-1) batch/head dims — handled by the index_map so the
    # full [B,H,Sq,Sk] mask is never materialized in HBM.
    m = jnp.asarray(attn_mask)
    while m.ndim < 4:
        m = m[None]
    Bm, Hm = m.shape[0], m.shape[1]
    m = jnp.broadcast_to(m, (Bm, Hm, Sq, Sk))   # only seq dims (cheap / usually no-op)

    # Flash tiles over (Sq, Sk); sized to stay far under 32 MiB scoped VMEM
    # (double-buffered) and well under v7x's 64 MiB physical VMEM.
    tq = _pick_tile(Sq, 256, 8)
    tk = _pick_tile(Sk, 512, 128)

    # Head batching when the per-head tile is tiny (amortize per-step overhead,
    # fill vregs/MXU for small Sq/D).
    Hb = 1
    if tq == Sq and tk == Sk and Sq * Sk * 4 <= (1 << 20):
        for cand in range(H, 0, -1):
            if H % cand == 0 and cand * Sq * Sk * 4 <= (2 << 20):
                Hb = cand
                break

    nh, nq, nk = H // Hb, Sq // tq, Sk // tk
    mask_h_blk = Hb if Hm != 1 else 1

    def q_map(b, h, qi, ki):
        return (b, h, qi, 0)

    def kv_map(b, h, qi, ki):
        return (b, h, ki, 0)

    def mask_map(b, h, qi, ki):
        return (b if Bm != 1 else 0, h if Hm != 1 else 0, qi, ki)

    def o_map(b, h, qi, ki):
        return (b, h, qi, 0)

    kernel = functools.partial(_sdpa_flash_kernel, scale=1.0 / math.sqrt(D))

    out = pl.pallas_call(
        kernel,
        out_shape=jax.ShapeDtypeStruct((B, H, Sq, D), query.dtype),
        grid_spec=pltpu.PrefetchScalarGridSpec(
            num_scalar_prefetch=0,
            grid=(B, nh, nq, nk),
            in_specs=[
                pl.BlockSpec((1, Hb, tq, D), q_map),
                pl.BlockSpec((1, Hb, tk, D), kv_map),
                pl.BlockSpec((1, Hb, tk, D), kv_map),
                pl.BlockSpec((1, mask_h_blk, tq, tk), mask_map),
            ],
            out_specs=pl.BlockSpec((1, Hb, tq, D), o_map),
            scratch_shapes=[
                pltpu.VMEM((Hb, tq, 1), jnp.float32),   # running max
                pltpu.VMEM((Hb, tq, 1), jnp.float32),   # running denom
                pltpu.VMEM((Hb, tq, D), jnp.float32),   # output accumulator
            ],
        ),
        compiler_params=pltpu.CompilerParams(
            dimension_semantics=("parallel", "parallel", "parallel", "arbitrary"),
            vmem_limit_bytes=32 * 1024 * 1024,
        ),
    )(query, key, value, m)
    return out


def _reference(query, key, value, attn_mask):
    d = query.shape[-1]
    qk = jnp.einsum("bhqd,bhkd->bhqk", query, key) / math.sqrt(d)
    qk = qk + attn_mask
    w = jax.nn.softmax(qk, axis=-1)
    return jnp.einsum("bhqk,bhkd->bhqd", w, value)


if __name__ == "__main__":
    key0 = jax.random.PRNGKey(0)
    kq, kk, kv, km = jax.random.split(key0, 4)

    B, H, S, D = 2, 4, 8, 32
    query = jax.random.normal(kq, (B, H, S, D), dtype=jnp.float32)
    key = jax.random.normal(kk, (B, H, S, D), dtype=jnp.float32)
    value = jax.random.normal(kv, (B, H, S, D), dtype=jnp.float32)
    # additive bias, broadcastable to [B,H,S,S]
    attn_mask = jax.random.normal(km, (B, H, S, S), dtype=jnp.float32) * 0.1

    out = scaled_dot_product_attention(query, key, value, attn_mask)
    out = jax.block_until_ready(out)

    ref = _reference(query, key, value, attn_mask)
    assert out.shape == (B, H, S, D)
    assert jnp.allclose(out, ref, atol=1e-4, rtol=1e-4), "mismatch vs reference"

    print("KERNEL_OK")
</pallas_src>

<mosaic_0001>
module attributes {stable_mosaic.version = 11 : i64} {
  func.func @_sdpa_flash_kernel(%arg0: i32, %arg1: i32, %arg2: i32, %arg3: i32, %arg4: memref<1x4x8x32xf32, #tpu.memory_space<vmem>>, %arg5: memref<1x4x8x32xf32, #tpu.memory_space<vmem>>, %arg6: memref<1x4x8x32xf32, #tpu.memory_space<vmem>>, %arg7: memref<1x4x8x8xf32, #tpu.memory_space<vmem>>, %arg8: memref<1x4x8x32xf32, #tpu.memory_space<vmem>>, %arg9: memref<4x8x1xf32, #tpu.memory_space<vmem>>, %arg10: memref<4x8x1xf32, #tpu.memory_space<vmem>>, %arg11: memref<4x8x32xf32, #tpu.memory_space<vmem>>) attributes {dimension_semantics = [#tpu.dimension_semantics<parallel>, #tpu.dimension_semantics<parallel>, #tpu.dimension_semantics<parallel>, #tpu.dimension_semantics<arbitrary>], iteration_bounds = array<i64: 2, 1, 1, 1>, scalar_prefetch = 0 : i64, scratch_operands = 3 : i64, tpu.core_type = #tpu.core_type<tc>, window_params = [{transform_indices = @transform_0, window_bounds = array<i64: 1, 4, 8, 32>}, {transform_indices = @transform_1, window_bounds = array<i64: 1, 4, 8, 32>}, {transform_indices = @transform_2, window_bounds = array<i64: 1, 4, 8, 32>}, {transform_indices = @transform_3, window_bounds = array<i64: 1, 4, 8, 8>}, {transform_indices = @transform_4, window_bounds = array<i64: 1, 4, 8, 32>}]} {
    %c0_i32 = arith.constant 0 : i32
    %0 = arith.cmpi eq, %arg3, %c0_i32 : i32
    %1 = arith.extui %0 : i1 to i32
    %c0_i32_0 = arith.constant 0 : i32
    %2 = arith.cmpi ne, %1, %c0_i32_0 : i32
    scf.if %2 {
      %cst_40 = arith.constant -1.000000e+30 : f32
      %40 = vector.broadcast %cst_40 : f32 to vector<4x8x1xf32>
      %c0_41 = arith.constant 0 : index
      %c0_42 = arith.constant 0 : index
      %c0_43 = arith.constant 0 : index
      %41 = vector.load %arg9[%c0_41, %c0_42, %c0_43] : memref<4x8x1xf32, #tpu.memory_space<vmem>>, vector<4x8x1xf32>
      tpu.vector_store %arg9[%c0_41, %c0_42, %c0_43], %40 {strides = array<i32>} : memref<4x8x1xf32, #tpu.memory_space<vmem>>, vector<4x8x1xf32>,
      %cst_44 = arith.constant 0.000000e+00 : f32
      %42 = vector.broadcast %cst_44 : f32 to vector<4x8x1xf32>
      %c0_45 = arith.constant 0 : index
      %c0_46 = arith.constant 0 : index
      %c0_47 = arith.constant 0 : index
      %43 = vector.load %arg10[%c0_45, %c0_46, %c0_47] : memref<4x8x1xf32, #tpu.memory_space<vmem>>, vector<4x8x1xf32>
      tpu.vector_store %arg10[%c0_45, %c0_46, %c0_47], %42 {strides = array<i32>} : memref<4x8x1xf32, #tpu.memory_space<vmem>>, vector<4x8x1xf32>,
      %cst_48 = arith.constant 0.000000e+00 : f32
      %44 = vector.broadcast %cst_48 : f32 to vector<4x8x32xf32>
      %c0_49 = arith.constant 0 : index
      %c0_50 = arith.constant 0 : index
      %c0_51 = arith.constant 0 : index
      %45 = vector.load %arg11[%c0_49, %c0_50, %c0_51] : memref<4x8x32xf32, #tpu.memory_space<vmem>>, vector<4x8x32xf32>
      tpu.vector_store %arg11[%c0_49, %c0_50, %c0_51], %44 {strides = array<i32>} : memref<4x8x32xf32, #tpu.memory_space<vmem>>, vector<4x8x32xf32>,
    } else {
    }
    %c0 = arith.constant 0 : index
    %c0_1 = arith.constant 0 : index
    %c0_2 = arith.constant 0 : index
    %c0_3 = arith.constant 0 : index
    %3 = vector.load %arg4[%c0, %c0_1, %c0_2, %c0_3] : memref<1x4x8x32xf32, #tpu.memory_space<vmem>>, vector<1x4x8x32xf32>
    %4 = vector.shape_cast %3 : vector<1x4x8x32xf32> to vector<4x8x32xf32>
    %cst = arith.constant 0.176776692 : f32
    %5 = vector.broadcast %cst : f32 to vector<4x8x32xf32>
    %6 = arith.mulf %4, %5 : vector<4x8x32xf32>
    %c0_4 = arith.constant 0 : index
    %c0_5 = arith.constant 0 : index
    %c0_6 = arith.constant 0 : index
    %c0_7 = arith.constant 0 : index
    %7 = vector.load %arg5[%c0_4, %c0_5, %c0_6, %c0_7] : memref<1x4x8x32xf32, #tpu.memory_space<vmem>>, vector<1x4x8x32xf32>
    %8 = vector.shape_cast %7 : vector<1x4x8x32xf32> to vector<4x8x32xf32>
    %c0_8 = arith.constant 0 : index
    %c0_9 = arith.constant 0 : index
    %c0_10 = arith.constant 0 : index
    %c0_11 = arith.constant 0 : index
    %9 = vector.load %arg6[%c0_8, %c0_9, %c0_10, %c0_11] : memref<1x4x8x32xf32, #tpu.memory_space<vmem>>, vector<1x4x8x32xf32>
    %10 = vector.shape_cast %9 : vector<1x4x8x32xf32> to vector<4x8x32xf32>
    %c0_12 = arith.constant 0 : index
    %c0_13 = arith.constant 0 : index
    %c0_14 = arith.constant 0 : index
    %c0_15 = arith.constant 0 : index
    %11 = vector.load %arg7[%c0_12, %c0_13, %c0_14, %c0_15] : memref<1x4x8x8xf32, #tpu.memory_space<vmem>>, vector<1x4x8x8xf32>
    %12 = vector.shape_cast %11 : vector<1x4x8x8xf32> to vector<4x8x8xf32>
    %cst_16 = arith.constant dense<0.000000e+00> : vector<4x8x8xf32>
    %13 = tpu.matmul %6, %8, %cst_16 {dimension_numbers = #tpu.dot_dimension_numbers<[2], [2], [1], [1], [0, 0, 0, 1, 1, 1], [0], [0]>} : vector<4x8x32xf32>, vector<4x8x32xf32>, vector<4x8x8xf32> -> vector<4x8x8xf32>
    %14 = arith.addf %13, %12 : vector<4x8x8xf32>
    %c0_17 = arith.constant 0 : index
    %c0_18 = arith.constant 0 : index
    %c0_19 = arith.constant 0 : index
    %15 = vector.load %arg9[%c0_17, %c0_18, %c0_19] : memref<4x8x1xf32, #tpu.memory_space<vmem>>, vector<4x8x1xf32>
    %cst_20 = arith.constant dense<0xFF800000> : vector<4x8xf32>
    %16 = vector.multi_reduction <maximumf>, %14, %cst_20 [2] : vector<4x8x8xf32> to vector<4x8xf32>
    %17 = vector.shape_cast %16 : vector<4x8xf32> to vector<4x8x1xf32>
    %18 = arith.maximumf %15, %17 : vector<4x8x1xf32>
    %19 = arith.subf %15, %18 : vector<4x8x1xf32>
    %20 = math.exp %19 : vector<4x8x1xf32>
    %21 = vector.broadcast %18 : vector<4x8x1xf32> to vector<4x8x8xf32>
    %22 = arith.subf %14, %21 : vector<4x8x8xf32>
    %23 = math.exp %22 : vector<4x8x8xf32>
    %c0_21 = arith.constant 0 : index
    %c0_22 = arith.constant 0 : index
    %c0_23 = arith.constant 0 : index
    %24 = vector.load %arg10[%c0_21, %c0_22, %c0_23] : memref<4x8x1xf32, #tpu.memory_space<vmem>>, vector<4x8x1xf32>
    %25 = arith.mulf %20, %24 : vector<4x8x1xf32>
    %cst_24 = arith.constant dense<0.000000e+00> : vector<4x8xf32>
    %26 = vector.multi_reduction <add>, %23, %cst_24 [2] : vector<4x8x8xf32> to vector<4x8xf32>
    %27 = vector.shape_cast %26 : vector<4x8xf32> to vector<4x8x1xf32>
    %28 = arith.addf %25, %27 : vector<4x8x1xf32>
    %c0_25 = arith.constant 0 : index
    %c0_26 = arith.constant 0 : index
    %c0_27 = arith.constant 0 : index
    %29 = vector.load %arg10[%c0_25, %c0_26, %c0_27] : memref<4x8x1xf32, #tpu.memory_space<vmem>>, vector<4x8x1xf32>
    tpu.vector_store %arg10[%c0_25, %c0_26, %c0_27], %28 {strides = array<i32>} : memref<4x8x1xf32, #tpu.memory_space<vmem>>, vector<4x8x1xf32>,
    %cst_28 = arith.constant dense<0.000000e+00> : vector<4x8x32xf32>
    %30 = tpu.matmul %23, %10, %cst_28 {dimension_numbers = #tpu.dot_dimension_numbers<[2], [1], [1], [2], [0, 0, 0, 1, 1, 2], [0], [0]>} : vector<4x8x8xf32>, vector<4x8x32xf32>, vector<4x8x32xf32> -> vector<4x8x32xf32>
    %c0_29 = arith.constant 0 : index
    %c0_30 = arith.constant 0 : index
    %c0_31 = arith.constant 0 : index
    %31 = vector.load %arg11[%c0_29, %c0_30, %c0_31] : memref<4x8x32xf32, #tpu.memory_space<vmem>>, vector<4x8x32xf32>
    %32 = vector.broadcast %20 : vector<4x8x1xf32> to vector<4x8x32xf32>
    %33 = arith.mulf %32, %31 : vector<4x8x32xf32>
    %34 = arith.addf %33, %30 : vector<4x8x32xf32>
    %c0_32 = arith.constant 0 : index
    %c0_33 = arith.constant 0 : index
    %c0_34 = arith.constant 0 : index
    %35 = vector.load %arg11[%c0_32, %c0_33, %c0_34] : memref<4x8x32xf32, #tpu.memory_space<vmem>>, vector<4x8x32xf32>
    tpu.vector_store %arg11[%c0_32, %c0_33, %c0_34], %34 {strides = array<i32>} : memref<4x8x32xf32, #tpu.memory_space<vmem>>, vector<4x8x32xf32>,
    %c0_35 = arith.constant 0 : index
    %c0_36 = arith.constant 0 : index
    %c0_37 = arith.constant 0 : index
    %36 = vector.load %arg9[%c0_35, %c0_36, %c0_37] : memref<4x8x1xf32, #tpu.memory_space<vmem>>, vector<4x8x1xf32>
    tpu.vector_store %arg9[%c0_35, %c0_36, %c0_37], %18 {strides = array<i32>} : memref<4x8x1xf32, #tpu.memory_space<vmem>>, vector<4x8x1xf32>,
    %c0_i32_38 = arith.constant 0 : i32
    %37 = arith.cmpi eq, %arg3, %c0_i32_38 : i32
    %38 = arith.extui %37 : i1 to i32
    %c0_i32_39 = arith.constant 0 : i32
    %39 = arith.cmpi ne, %38, %c0_i32_39 : i32
    scf.if %39 {
      %c0_40 = arith.constant 0 : index
      %c0_41 = arith.constant 0 : index
      %c0_42 = arith.constant 0 : index
      %40 = vector.load %arg11[%c0_40, %c0_41, %c0_42] : memref<4x8x32xf32, #tpu.memory_space<vmem>>, vector<4x8x32xf32>
      %c0_43 = arith.constant 0 : index
      %c0_44 = arith.constant 0 : index
      %c0_45 = arith.constant 0 : index
      %41 = vector.load %arg10[%c0_43, %c0_44, %c0_45] : memref<4x8x1xf32, #tpu.memory_space<vmem>>, vector<4x8x1xf32>
      %42 = vector.broadcast %41 : vector<4x8x1xf32> to vector<4x8x32xf32>
      %43 = arith.divf %40, %42 : vector<4x8x32xf32>
      %c0_46 = arith.constant 0 : index
      %c0_47 = arith.constant 0 : index
      %c0_48 = arith.constant 0 : index
      %c0_49 = arith.constant 0 : index
      %44 = vector.load %arg8[%c0_46, %c0_47, %c0_48, %c0_49] : memref<1x4x8x32xf32, #tpu.memory_space<vmem>>, vector<1x4x8x32xf32>
      %45 = vector.shape_cast %44 : vector<1x4x8x32xf32> to vector<4x8x32xf32>
      %46 = vector.shape_cast %43 : vector<4x8x32xf32> to vector<1x4x8x32xf32>
      tpu.vector_store %arg8[%c0_46, %c0_47, %c0_48, %c0_49], %46 {strides = array<i32>} : memref<1x4x8x32xf32, #tpu.memory_space<vmem>>, vector<1x4x8x32xf32>,
    } else {
    }
    return
  }
  func.func @transform_0(%arg0: i32, %arg1: i32, %arg2: i32, %arg3: i32) -> (i32, i32, i32, i32) {
    %c0_i32 = arith.constant 0 : i32
    %c0_i32_0 = arith.constant 0 : i32
    return %arg0, %arg1, %arg2, %c0_i32 : i32, i32, i32, i32
  }
  func.func @transform_1(%arg0: i32, %arg1: i32, %arg2: i32, %arg3: i32) -> (i32, i32, i32, i32) {
    %c0_i32 = arith.constant 0 : i32
    %c0_i32_0 = arith.constant 0 : i32
    return %arg0, %arg1, %arg3, %c0_i32 : i32, i32, i32, i32
  }
  func.func @transform_2(%arg0: i32, %arg1: i32, %arg2: i32, %arg3: i32) -> (i32, i32, i32, i32) {
    %c0_i32 = arith.constant 0 : i32
    %c0_i32_0 = arith.constant 0 : i32
    return %arg0, %arg1, %arg3, %c0_i32 : i32, i32, i32, i32
  }
  func.func @transform_3(%arg0: i32, %arg1: i32, %arg2: i32, %arg3: i32) -> (i32, i32, i32, i32) {
    %c0_i32 = arith.constant 0 : i32
    return %arg0, %arg1, %arg2, %arg3 : i32, i32, i32, i32
  }
  func.func @transform_4(%arg0: i32, %arg1: i32, %arg2: i32, %arg3: i32) -> (i32, i32, i32, i32) {
    %c0_i32 = arith.constant 0 : i32
    %c0_i32_0 = arith.constant 0 : i32
    return %arg0, %arg1, %arg2, %c0_i32 : i32, i32, i32, i32
  }
}

</mosaic_0001>

<bundles_post_ra>
// kernel: tpu_custom_call.1
= control target key start
LH: loop header
LB: loop body
LE: loop exit
PB: predicated region body
PF: predicated region fallthrough
CT: control target
= control target key end

     0   :  { %s2308_s0 = inlined_call_operand.hbm [shape: f32[2,4,8,32], index: 0, kind: input, shape index: {}]   ;;  %s2309_s1 = inlined_call_operand.hbm [shape: f32[2,4,8,32], index: 1, kind: input, shape index: {}]   ;;  %s2310_s2 = inlined_call_operand.hbm [shape: f32[2,4,8,32], index: 2, kind: input, shape index: {}]   ;;  %s2311_s3 = inlined_call_operand.hbm [shape: f32[2,4,8,8], index: 3, kind: input, shape index: {}]   ;;  %s2312_s4 = inlined_call_operand.hbm [shape: f32[2,4,8,32], index: 4, kind: output, shape index: {}]  }
   0x1   :  { %2324 = sst [smem:[#allocation23_spill]] %s2308_s0 }
   0x2   :  { %2325 = sst [smem:[#allocation24_spill]] %s2309_s1 }
   0x3   :  { %9 = vsyncpa [#allocation6], 0 }
   0x4   :  { %11 = vsyncpa [#allocation6 + $0x1], 0 }
   0x5   :  { %12 = vsyncpa [#allocation9], 0 }
   0x6   :  { %14 = vsyncpa [#allocation9 + $0x1], 0 }
   0x7   :  { %15 = vsyncpa [#allocation12], 0 }
   0x8   :  { %17 = vsyncpa [#allocation12 + $0x1], 0 }
   0x9   :  { %18 = vsyncpa [#allocation7], 0 }
   0xa   :  { %20 = vsyncpa [#allocation7 + $0x1], 0  ;;  %s1863_s15 = smov 0   ;;  %s1865_s16 = smov 0  }
   0xb   :  { %s1867_s17 = smov 0   ;;  %s1869_s18 = smov 0  }
   0xc   :  { %s1871_s19 = smov 0   ;;  %s1873_s20 = smov 0  }
   0xd LB: > { %2326 = sst [smem:[#allocation18_spill]] %s1811_s17  ;;  %s1894_s21 = sadd.s32 4294967295, %s1823_s20   ;;  %s1823_s20 = sphi %s1873_s20, %s26_s20   ;;  %s1819_s19 = sphi %s1871_s19, %s2353_s19   ;;  %s1815_s18 = sphi %s1869_s18, %s2352_s18   ;;  %s1811_s17 = sphi %s1867_s17, %s2351_s17   ;;  %s1807_s16 = sphi %s1865_s16, %s2355_s16   ;;  %s1803_s15 = sphi %s1863_s15, %s2354_s15  }
   0xe   : > { %2327 = sst [smem:[#allocation19_spill]] %s1819_s19  ;;  %s1403_s22 = sadd.s32 4294967294, %s1823_s20  }
   0xf   : > { %2328 = sst [smem:[#allocation20_spill]] %s1823_s20  ;;  %s52_s23 = sadd.s32 1, %s1819_s19 }
  0x10   : > { %s63_s24 = sadd.s32 1, %s1811_s17  ;;  %p54_p0 = scmp.ge.s32.totalorder %s52_s23, 2 }
  0x11   : > { %p70_p1 = scmp.ne.s32.totalorder %s1811_s17, %s1807_s16  ;;  %p71_p2 = scmp.eq.s32.totalorder %s1823_s20, 0 }
  0x12   : > { %p76_p3 = scmp.ne.s32.totalorder %s1807_s16, %s1803_s15  ;;  %s2357_s23 = smov (%p54_p0, %s52_s23), 0 }
  0x13   : > { %2329 = sst [smem:[#allocation21_spill]] %s2357_s23  ;;  %p1906_p4 = por %p71_p2, %p70_p1 }
  0x14   : > { %p77_p5 = scmp.eq.s32.totalorder %s1894_s21, 0  ;;  %s56_s26 = ssub.s32 %s1819_s19, %s2357_s23 }
  0x15   : > { %p196_p6 = scmp.eq.s32.totalorder %s1894_s21, 1  ;;  %p61_p7 = scmp.eq.s32.totalorder %s56_s26, 0 }
  0x16   : > { %p1914_p8 = por %p77_p5, %p76_p3  ;;  %p202_p10 = scmp.eq.s32.totalorder %s1403_s22, 1 }
  0x17   : > { %p1918_p9 = por %p196_p6, %p70_p1  ;;  %p1529_p13 = scmp.lt.s32.totalorder %s1823_s20, 2 }
  0x18   : > { %s2331_s27 = scalar_select %p1914_p8, 1, 0 }
  0x19   : > { %s2332_s28 = scalar_select %p1918_p9, 1, 0 }
  0x1a   : > { %s1923_s29 = scalar_select %p61_p7, %s1811_s17, %s63_s24  }
  0x1b   : > { %p1925_p11 = por %p202_p10, %p76_p3  ;;  %s1932_s5 = sand.u32 1, %s1811_s17  }
  0x1c   : > { %2333 = sst [smem:[#allocation22_spill]] %s1923_s29  ;;  %s1935_s6 = sshll.u32 %s1932_s5, 5 }
  0x1d   : > { %s2334_s30 = scalar_select %p1925_p11, 1, 0 }
  0x1e   : > { %s1938_s7 = sshll.u32 %s1819_s19, 9  ;;  %p1942_p0 = pnand %p1529_p13, %p1906_p4 }
  0x1f   : > { %s246_s9 = sand.u32 1, %s1823_s20   ;;  %s2336_s1 = sld [smem:[#allocation24_spill]] }
  0x20   : > { %s250_s13 = scalar_lea.vmem [#allocation8], %s1935_s6  ;;  %s1958_s22 = scalar_lea.sflag [#allocation9], %s246_s9 }
  0x21   : > { %s260_s14 = sshll.u32 %s250_s13, 4  ;;  %p1964_p4 = pneg %p1942_p0  ;;  %s1955_s14 = int_to_ptr.vmem [resolvable:$true] %s260_s14 }
  0x25   : > { %s1951_s12 = scalar_lea.hbm %s2336_s1, %s1938_s7  ;;  %s1618_s11 = scalar_lea.hbm %s2336_s1, 1024 }
  0x26   : > { %s1613_s24 = scalar_lea.hbm %s1951_s12, 512  ;;  %p1619_p7 = scmp.lt.u32.totalorder %s1951_s12, %s2336_s1 }
  0x27   : > { %p1614_p3 = scmp.ne.s32.totalorder %s1951_s12, %s1613_s24  ;;  %p1620_p10 = scmp.lt.u32.totalorder %s1618_s11, %s1613_s24 }
  0x28   : > { %p1622_p12 = scmp.lt.u32.totalorder %s1613_s24, %s1951_s12 }
  0x29   : > { %p1616_p5 = pnand %p1964_p4, %p1614_p3  ;;  %p1621_p13 = por %p1620_p10, %p1619_p7 }
  0x2b   : > { %p1617_p6 = pneg %p1616_p5  ;;  %p1623_p1 = por %p1622_p12, %p1621_p13 }
  0x2d   : > { %p1624_p2 = pnand %p1623_p1, %p1617_p6 }
  0x2f   : > { %1627 = shalt.err (!%p1624_p2)
}
  0x30   : > { %s1628_s9 = scalar_lea.vmem %s1955_s14, 512  ;;  %s1825_s26 = smov [#allocation8]  }
  0x31   : > { %p1629_p3 = scmp.ne.s32.totalorder %s1955_s14, %s1628_s9  ;;  %s1633_s10 = sshll.u32 %s1825_s26, 4  ;;  %s1634_s10 = int_to_ptr.vmem [resolvable:$false] %s1633_s10 }
  0x32   : > { %s1635_s23 = scalar_lea.vmem %s1634_s10, 1024  ;;  %p1636_p9 = scmp.lt.s32.totalorder %s1955_s14, %s1634_s10 }
  0x33   : > { %p1631_p5 = pnand %p1629_p3, %p1964_p4  ;;  %p1637_p8 = scmp.lt.s32.totalorder %s1635_s23, %s1628_s9 }
  0x35   : > { %p1632_p11 = pneg %p1631_p5  ;;  %p1638_p7 = por %p1637_p8, %p1636_p9 }
  0x37   : > { %p1639_p10 = pnand %p1638_p7, %p1632_p11 }
  0x39   : > { %1642 = shalt.err (!%p1639_p10)
}
  0x3a   : > { %s2316_s24 = smov 128   ;;  %s2318_s11 = smov 8  }
  0x3b   : > { %1518 = dma.hbm_to_vmem [thread:$0]  (!%p1942_p0), %s1951_s12, 512, %s1955_s14, %s1958_s22, %s2316_s24, %s2316_s24, %s2318_s11  }
  0x3c   : > { %p2338_p8 = scmp.lt.s32.totalorder %s1823_s20, 3  ;;  %p2339_p9 = scmp.ge.s32.totalorder %s1823_s20, 1 }
  0x3d   : > { %s2341_s0 = sld [smem:[#allocation23_spill]]  ;;  %s226_s23 = scalar_lea.vmem [#allocation5], %s1935_s6 }
  0x3e   : > { %p1995_p11 = pnand %p2339_p9, %p2338_p8  ;;  %s236_s1 = sshll.u32 %s226_s23, 4  ;;  %s2006_s1 = int_to_ptr.vmem [resolvable:$true] %s236_s1 }
  0x3f   : > { %s2012_s24 = scalar_lea.hbm %s2310_s2, %s1938_s7  ;;  %s223_s11 = scalar_lea.sflag [#allocation6], %s1932_s5 }
  0x40   : > { %s2340_s13 = scalar_select %p1995_p11, 1, 0 }
  0x43   : > { %s2003_s10 = scalar_lea.hbm %s2341_s0, %s1938_s7  ;;  %s1648_s29 = scalar_lea.hbm %s2341_s0, 1024 }
  0x44   : > { %s1643_s19 = scalar_lea.hbm %s2003_s10, 512  ;;  %p1649_p6 = scmp.lt.u32.totalorder %s2003_s10, %s2341_s0 }
  0x45   : > { %p1644_p12 = scmp.ne.s32.totalorder %s2003_s10, %s1643_s19  ;;  %p1650_p13 = scmp.lt.u32.totalorder %s1648_s29, %s1643_s19 }
  0x46   : > { %p1652_p5 = scmp.lt.u32.totalorder %s1643_s19, %s2003_s10 }
  0x47   : > { %p1646_p1 = pnand %p1644_p12, %p1964_p4  ;;  %p1651_p3 = por %p1650_p13, %p1649_p6 }
  0x49   : > { %p1647_p2 = pneg %p1646_p1  ;;  %p1653_p7 = por %p1652_p5, %p1651_p3 }
  0x4b   : > { %p1654_p10 = pnand %p1653_p7, %p1647_p2 }
  0x4d   : > { %1657 = shalt.err (!%p1654_p10)
}
  0x4e   : > { %s1658_s23 = scalar_lea.vmem %s2006_s1, 512  ;;  %s1828_s12 = smov [#allocation5]  }
  0x4f   : > { %p1659_p8 = scmp.ne.s32.totalorder %s2006_s1, %s1658_s23  ;;  %s1663_s14 = sshll.u32 %s1828_s12, 4  ;;  %s1664_s14 = int_to_ptr.vmem [resolvable:$false] %s1663_s14 }
  0x50   : > { %s1665_s17 = scalar_lea.vmem %s1664_s14, 1024  ;;  %p1666_p1 = scmp.lt.s32.totalorder %s2006_s1, %s1664_s14 }
  0x51   : > { %p1661_p9 = pnand %p1659_p8, %p1964_p4  ;;  %p1667_p11 = scmp.lt.s32.totalorder %s1665_s17, %s1658_s23 }
  0x53   : > { %p1662_p12 = pneg %p1661_p9  ;;  %p1668_p6 = por %p1667_p11, %p1666_p1 }
  0x55   : > { %p1669_p13 = pnand %p1668_p6, %p1662_p12 }
  0x57   : > { %1672 = shalt.err (!%p1669_p13)
}
  0x58   : > { %s2342_s19 = smov 8   ;;  %s2343_s20 = smov 128  }
  0x59   : > { %1515 = dma.hbm_to_vmem [thread:$0]  (!%p1942_p0), %s2003_s10, 512, %s2006_s1, %s223_s11, %s2343_s20, %s2343_s20, %s2342_s19  }
  0x5a   : > { %s274_s29 = scalar_lea.vmem [#allocation10], %s1935_s6  ;;  %s1673_s26 = scalar_lea.hbm %s2012_s24, 512 }
  0x5b   : > { %s284_s9 = sshll.u32 %s274_s29, 4  ;;  %p1674_p11 = scmp.ne.s32.totalorder %s2012_s24, %s1673_s26  ;;  %s2042_s9 = int_to_ptr.vmem [resolvable:$true] %s284_s9 }
  0x5c   : > { %s1678_s14 = scalar_lea.hbm %s2310_s2, 1024  ;;  %p1679_p5 = scmp.lt.u32.totalorder %s2012_s24, %s2310_s2 }
  0x5d   : > { %p1676_p2 = pnand %p1674_p11, %p1964_p4  ;;  %p1680_p7 = scmp.lt.u32.totalorder %s1678_s14, %s1673_s26 }
  0x5e   : > { %p1682_p8 = scmp.lt.u32.totalorder %s1673_s26, %s2012_s24 }
  0x5f   : > { %p1677_p3 = pneg %p1676_p2  ;;  %p1681_p10 = por %p1680_p7, %p1679_p5 }
  0x61   : > { %p1683_p9 = por %p1682_p8, %p1681_p10 }
  0x63   : > { %p1684_p12 = pnand %p1683_p9, %p1677_p3 }
  0x65   : > { %1687 = shalt.err (!%p1684_p12)
}
  0x66   : > { %s1688_s1 = scalar_lea.vmem %s2042_s9, 512  ;;  %s1829_s11 = smov [#allocation10]  }
  0x67   : > { %p1689_p1 = scmp.ne.s32.totalorder %s2042_s9, %s1688_s1  ;;  %s1693_s10 = sshll.u32 %s1829_s11, 4  ;;  %s1694_s10 = int_to_ptr.vmem [resolvable:$false] %s1693_s10 }
  0x68   : > { %s1695_s0 = scalar_lea.vmem %s1694_s10, 1024  ;;  %p1696_p11 = scmp.lt.s32.totalorder %s2042_s9, %s1694_s10 }
  0x69   : > { %p1691_p6 = pnand %p1689_p1, %p1964_p4  ;;  %p1697_p2 = scmp.lt.s32.totalorder %s1695_s0, %s1688_s1 }
  0x6b   : > { %p1692_p13 = pneg %p1691_p6  ;;  %p1698_p5 = por %p1697_p2, %p1696_p11 }
  0x6d   : > { %p1699_p7 = pnand %p1698_p5, %p1692_p13 }
  0x6f   : > { %1702 = shalt.err (!%p1699_p7)
}
  0x70   : > { %1521 = dma.hbm_to_vmem [thread:$0]  (!%p1942_p0), %s2012_s24, 512, %s2042_s9, %s1958_s22, %s2343_s20, %s2343_s20, %s2342_s19  }
  0x71   : > { %s2073_s23 = scalar_lea.hbm %s2311_s3, %s1938_s7  ;;  %s298_s12 = scalar_lea.vmem [#allocation11], %s1935_s6 }
  0x72   : > { %s309_s14 = sshll.u32 %s298_s12, 4  ;;  %s295_s17 = scalar_lea.sflag [#allocation12], %s1932_s5  ;;  %s2076_s14 = int_to_ptr.vmem [resolvable:$true] %s309_s14 }
  0x73   : > { %s1703_s1 = scalar_lea.hbm %s2073_s23, 512  ;;  %s1708_s9 = scalar_lea.hbm %s2311_s3, 1024 }
  0x74   : > { %p1704_p3 = scmp.ne.s32.totalorder %s2073_s23, %s1703_s1  ;;  %p1709_p9 = scmp.lt.u32.totalorder %s2073_s23, %s2311_s3 }
  0x75   : > { %p1710_p12 = scmp.lt.u32.totalorder %s1708_s9, %s1703_s1  ;;  %p1712_p6 = scmp.lt.u32.totalorder %s1703_s1, %s2073_s23 }
  0x76   : > { %p1706_p10 = pnand %p1704_p3, %p1964_p4 }
  0x77   : > { %p1711_p1 = por %p1710_p12, %p1709_p9 }
  0x78   : > { %p1707_p8 = pneg %p1706_p10 }
  0x79   : > { %p1713_p13 = por %p1712_p6, %p1711_p1 }
  0x7b   : > { %p1714_p11 = pnand %p1713_p13, %p1707_p8 }
  0x7d   : > { %1717 = shalt.err (!%p1714_p11)
}
  0x7e   : > { %s1718_s6 = scalar_lea.vmem %s2076_s14, 512  ;;  %s1830_s10 = smov [#allocation11]  }
  0x7f   : > { %p1719_p2 = scmp.ne.s32.totalorder %s2076_s14, %s1718_s6  ;;  %s1723_s0 = sshll.u32 %s1830_s10, 4  ;;  %s1724_s0 = int_to_ptr.vmem [resolvable:$false] %s1723_s0 }
  0x80   : > { %s1725_s29 = scalar_lea.vmem %s1724_s0, 1024  ;;  %p1726_p3 = scmp.lt.s32.totalorder %s2076_s14, %s1724_s0 }
  0x81   : > { %p1721_p5 = pnand %p1719_p2, %p1964_p4  ;;  %p1727_p10 = scmp.lt.s32.totalorder %s1725_s29, %s1718_s6 }
  0x83   : > { %p1722_p7 = pneg %p1721_p5  ;;  %p1728_p9 = por %p1727_p10, %p1726_p3 }
  0x85   : > { %p1729_p12 = pnand %p1728_p9, %p1722_p7 }
  0x87   : > { %1732 = shalt.err (!%p1729_p12)
}
  0x88   : > { %1524 = dma.hbm_to_vmem [thread:$0]  (!%p1942_p0), %s2073_s23, 512, %s2076_s14, %s295_s17, %s2343_s20, %s2343_s20, %s2342_s19  }
  0x89   : > { %p2344_p4 = scmp.ne.s32.totalorder %s2340_s13, 0 }
  0x8a   : > { %s2108_s25 = sand.u32 (!%p2344_p4), 1, %s1807_s16   ;;  %p2345_p8 = scmp.ne.s32.totalorder (!%p2344_p4), %s2331_s27, 0 }
  0x8b   : > { %321 = sbr.rel (%p2344_p4) target bundleno = 982 (0x3d6), region = 36  ;;  %s2111_s26 = sshll.u32 (!%p2344_p4), %s2108_s25, 5 }
  0x8c   : > { %s324_s8 = scalar_lea.sflag (!%p2344_p4), [#allocation6], %s2108_s25  ;;  %s2115_s12 = scalar_lea.vmem (!%p2344_p4), [#allocation5], %s2111_s26 }
  0x92   : > { %1786 = dma.done.wait (%p2345_p8), %s324_s8, 512  }
  0x93   : > { %1788 = vsyncadd (%p2345_p8), %s324_s8, 4294966784  ;;  %s332_s5 = sand.u32 1, %s1894_s21   ;;  %s2123_s19 = scalar_lea.vmem [#allocation8], %s2111_s26 }
  0x94   : > { %s333_s13 = scalar_lea.sflag [#allocation9], %s332_s5 }
  0x95   : > { %1790 = dma.done.wait (%p2345_p8), %s333_s13, 1024  }
  0x96   : > { %1792 = vsyncadd (%p2345_p8), %s333_s13, 4294966272  ;;  %s2130_s20 = scalar_lea.vmem [#allocation10], %s2111_s26  ;;  %s351_s23 = scalar_lea.sflag [#allocation12], %s2108_s25 }
  0x97   : > { %s2134_s14 = scalar_lea.vmem [#allocation11], %s2111_s26 }
  0x98   : > { %1794 = dma.done.wait (%p2345_p8), %s351_s23, 512  }
  0x99   : > { %1796 = vsyncadd (%p2345_p8), %s351_s23, 4294966784  ;;  %vm412_vm0 = vcmask 261120   ;;  %v1831_v0 = vmov 0.0   ;;  %vm1832_vm1 = vmmov 0   ;;  %v425_v1 = vld [vmem:[%s2123_s19] sm:$0xff]  ;;  %v426_v3 = vld [vmem:[%s2123_s19 + $0x8] sm:$0xff] }
  0x9a   : > { %1462 = vmatprep.subr.mxu0 %v1831_v0  ;;  %413 = vst.msk [vmem:[#allocation4] sm:$0xff] %vm412_vm0, %v1831_v0  ;;  %414 = vst.msk [vmem:[#allocation4 + $0x8] sm:$0xff] %vm412_vm0, %v1831_v0  ;;  %1464 = vmatprep.mubr.msk.f32.mxu0 %vm1832_vm1, %v1831_v0  ;;  %v417_v2 = vld [vmem:[%s2115_s12] sm:$0xff]  ;;  %v418_v5 = vld [vmem:[%s2115_s12 + $0x8] sm:$0xff]  ;;  %vm403_vm2 = vcmask 7168   ;;  %vm746_vm3 = vcmask 64512  }
  0x9b   : > { %415 = vst.msk [vmem:[#allocation4 + $0x10] sm:$0xff] %vm412_vm0, %v1831_v0  ;;  %416 = vst.msk [vmem:[#allocation4 + $0x18] sm:$0xff] %vm412_vm0, %v1831_v0  ;;  %1467 = vmatprep.subr.mxu1 %v1831_v0  ;;  %1469 = vmatprep.mubr.msk.f32.mxu1 %vm1832_vm1, %v1831_v0  ;;  %v421_v4 = vmul.f32 0.17677669, %v417_v2  ;;  %v419_v6 = vld [vmem:[%s2115_s12 + $0x10] sm:$0xff]  ;;  %v420_v9 = vld [vmem:[%s2115_s12 + $0x18] sm:$0xff] }
  0x9c   : > { %1463 = vmatpush3.xpose.msk.msra.mxu0 %vm412_vm0, %v425_v1  ;;  %1468 = vmatpush3.xpose.msk.msra.mxu1 %vm412_vm0, %v426_v3  ;;  %v422_v7 = vmul.f32 0.17677669, %v418_v5  ;;  %v427_v8 = vld [vmem:[%s2123_s19 + $0x10] sm:$0xff]  ;;  %v428_v10 = vld [vmem:[%s2123_s19 + $0x18] sm:$0xff]  ;;  %v423_v11 = vmul.f32 0.17677669, %v419_v6 }
  0x9d   : > { %1472 = vmatprep.subr.mxu0 %v1831_v0  ;;  %1477 = vmatprep.subr.mxu1 %v1831_v0  ;;  %v424_v12 = vmul.f32 0.17677669, %v420_v9  ;;  %v1833_v13 = vmov -1e+30   ;;  %408 = vst.msk [vmem:[#allocation3] sm:$0xff] %vm403_vm2, %v1831_v0  ;;  %409 = vst.msk [vmem:[#allocation3 + $0x8] sm:$0xff] %vm403_vm2, %v1831_v0 }
  0x9e   : > { %404 = vst.msk [vmem:[#allocation2] sm:$0xff] %vm403_vm2, %v1833_v13  ;;  %405 = vst.msk [vmem:[#allocation2 + $0x8] sm:$0xff] %vm403_vm2, %v1833_v13  ;;  %v433_v14 = vld [vmem:[%s2134_s14] sm:$0xff]  ;;  %v434_v15 = vld [vmem:[%s2134_s14 + $0x8] sm:$0xff]  ;;  %v1834_v34 = vmov 0   ;;  %s393_s21 = scalar_lea.vmem [#allocation13], %s2111_s26 }
  0x9f   : > { %1465 = vmatmul.mubr.msk.f32.vlgmr.msra.gmra.mrb[0].mxu0 %vm412_vm0, %v421_v4  ;;  %1470 = vmatmul.mubr.msk.f32.vlgmr.msra.gmra.mrb[0].mxu1 %vm412_vm0, %v422_v7  ;;  %406 = vst.msk [vmem:[#allocation2 + $0x10] sm:$0xff] %vm403_vm2, %v1833_v13  ;;  %407 = vst.msk [vmem:[#allocation2 + $0x18] sm:$0xff] %vm403_vm2, %v1833_v13  ;;  %v435_v22 = vld [vmem:[%s2134_s14 + $0x10] sm:$0xff]  ;;  %v436_v24 = vld [vmem:[%s2134_s14 + $0x18] sm:$0xff]  ;;  %s1445_s27 = sshll.u32 %s1815_s18, 9  ;;  %s1228_s17 = sshll.u32 %s393_s21, 4  ;;  %s2258_s17 = int_to_ptr.vmem [resolvable:$true] %s1228_s17 }
  0xa0   : > { %1473 = vmatpush3.xpose.msk.msra.mxu0 %vm412_vm0, %v427_v8  ;;  %1474 = vmatprep.mubr.msk.f32.mxu0 %vm1832_vm1, %v1831_v0  ;;  %410 = vst.msk [vmem:[#allocation3 + $0x10] sm:$0xff] %vm403_vm2, %v1831_v0  ;;  %411 = vst.msk [vmem:[#allocation3 + $0x18] sm:$0xff] %vm403_vm2, %v1831_v0  ;;  %v429_v51 = vld [vmem:[%s2130_s20] sm:$0xff]  ;;  %v430_v52 = vld [vmem:[%s2130_s20 + $0x8] sm:$0xff]  ;;  %s2256_s24 = scalar_lea.hbm %s2312_s4, %s1445_s27  ;;  %s1212_s9 = scalar_lea.sflag [#allocation7], %s2108_s25 }
  0xa1   : > { %1478 = vmatpush3.xpose.msk.msra.mxu1 %vm412_vm0, %v428_v10  ;;  %1479 = vmatprep.mubr.msk.f32.mxu1 %vm1832_vm1, %v1831_v0  ;;  %v431_v1 = vld [vmem:[%s2130_s20 + $0x10] sm:$0xff]  ;;  %v432_v5 = vld [vmem:[%s2130_s20 + $0x18] sm:$0xff]  ;;  %s1733_s18 = scalar_lea.vmem %s2258_s17, 512  ;;  %p2346_p1 = scmp.ne.s32.totalorder %s2332_s28, 0 }
  0xa2   : > { %1482 = vmatprep.subr.mxu0 %v1831_v0  ;;  %1487 = vmatprep.subr.mxu1 %v1831_v0  ;;  %p1734_p0 = scmp.ne.s32.totalorder %s2258_s17, %s1733_s18  ;;  %s1835_s7 = smov [#allocation13]  }
  0xa3   : > { %1475 = vmatmul.mubr.msk.f32.vlgmr.msra.gmra.mrb[2].mxu0 %vm412_vm0, %v423_v11  ;;  %1587 = vset.pattern.permute.xlu0 %v1834_v34  ;;  %s1737_s11 = sshll.u32 %s1835_s7, 4  ;;  %s1738_s11 = int_to_ptr.vmem [resolvable:$false] %s1737_s11 }
  0xa4   : > { %1480 = vmatmul.mubr.msk.f32.vlgmr.msra.gmra.mrb[2].mxu1 %vm412_vm0, %v424_v12  ;;  %1484 = vmatprep.mubr.msk.f32.mxu0 %vm1832_vm1, %v1831_v0  ;;  %p1735_p6 = pnand %p1734_p0, %p2346_p1  ;;  %s1739_s6 = scalar_lea.vmem %s1738_s11, 1024 }
  0xa5   : > { %1489 = vmatprep.mubr.msk.f32.mxu1 %vm1832_vm1, %v1831_v0  ;;  %1588 = vset.pattern.permute.xlu1 %v1834_v34  ;;  %v2202_v35 = vld [vmem:[#allocation2] sm:$0xff]  ;;  %v743_v38 = vld [vmem:[#allocation2 + $0x8] sm:$0xff]  ;;  %p1740_p11 = scmp.lt.s32.totalorder %s2258_s17, %s1738_s11  ;;  %p1741_p2 = scmp.lt.s32.totalorder %s1739_s6, %s1733_s18 }
  0xa6   : > { %v2207_v39 = vld [vmem:[#allocation2 + $0x10] sm:$0xff]  ;;  %v745_v45 = vld [vmem:[#allocation2 + $0x18] sm:$0xff]  ;;  %1483 = vmatpush3.msra.mxu0 %v429_v51  ;;  %1488 = vmatpush3.msra.mxu1 %v430_v52  ;;  %p1736_p13 = pneg %p1735_p6 }
  0xa7   : > { %1492 = vmatprep.subr.mxu0 %v1831_v0  ;;  %1497 = vmatprep.subr.mxu1 %v1831_v0  ;;  %p1742_p5 = por %p1741_p2, %p1740_p11 }
  0xa9   : > { %p1743_p7 = pnand %p1742_p5, %p1736_p13 }
 0x172   : > { %v510_v16 = vpop.f32.mrb[0].mxu0  ;;  %v586_v17 = vpop.f32.mrb[0].mxu1 }
 0x173   : > { %v511_v18 = vadd.f32 %v510_v16, %v433_v14  ;;  %v1466_v19 = vpop.f32.mrb[1].mxu0  ;;  %v587_v20 = vadd.f32 %v586_v17, %v434_v15  ;;  %v1471_v21 = vpop.f32.mrb[1].mxu1 }
 0x174   : > { %v807_v19 = vld [vmem:[#allocation3] sm:$0xff] }
 0x175   : > { %v747_v23 = vsel %vm746_vm3, %v511_v18, -inf  ;;  %v750_v27 = vsel %vm746_vm3, %v587_v20, -inf }
 0x176   : > { %748 = vmax.xlane.f32.xlu0 %v747_v23  ;;  %v662_v25 = vpop.f32.mrb[2].mxu0 }
 0x177   : > { %v663_v26 = vadd.f32 %v662_v25, %v435_v22  ;;  %v1476_v28 = vpop.f32.mrb[3].mxu0  ;;  %v738_v29 = vpop.f32.mrb[2].mxu1  ;;  %v808_v22 = vld [vmem:[#allocation3 + $0x8] sm:$0xff] }
 0x178   : > { %v739_v30 = vadd.f32 %v738_v29, %v436_v24  ;;  %v1481_v31 = vpop.f32.mrb[3].mxu1 }
 0x179   : > { %v753_v32 = vsel %vm746_vm3, %v663_v26, -inf }
 0x17a   : > { %751 = vmax.xlane.f32.xlu0 %v750_v27  ;;  %754 = vmax.xlane.f32.xlu1 %v753_v32  ;;  %v756_v33 = vsel %vm746_vm3, %v739_v30, -inf }
 0x17e   : > { %757 = vmax.xlane.f32.xlu1 %v756_v33 }
 0x203   : > { %v749_v36 = vpop.xlane.xlu0 %748 }
 0x204   : > { %v2205_v37 = vmax.f32 %v2202_v35, %v749_v36 }
 0x206   : > { %v763_v40 = vsub.f32 %v2202_v35, %v2205_v37  ;;  %1164 = vst.msk [vmem:[#allocation2] sm:$0xff] %vm403_vm2, %v2205_v37  ;;  %777 = vperm.xlu0 %1587, %v2205_v37  }
 0x207   : > { %v752_v41 = vpop.xlane.xlu0 %751  ;;  %v755_v42 = vpop.xlane.xlu1 %754 }
 0x208   : > { %v760_v43 = vmax.f32 %v743_v38, %v752_v41  ;;  %v761_v44 = vmax.f32 %v2207_v39, %v755_v42  ;;  %v767_v13 = vmul.f32 1.442695, %v763_v40  ;;  %v1129_v42 = vld [vmem:[#allocation4 + $0x8] sm:$0xff] }
 0x20a   : > { %v764_v46 = vsub.f32 %v743_v38, %v760_v43  ;;  %1165 = vst.msk [vmem:[#allocation2 + $0x8] sm:$0xff] %vm403_vm2, %v760_v43  ;;  %782 = vperm.xlu1 %1588, %v760_v43   ;;  %v765_v47 = vsub.f32 %v2207_v39, %v761_v44  ;;  %1166 = vst.msk [vmem:[#allocation2 + $0x10] sm:$0xff] %vm403_vm2, %v761_v44  ;;  %v1128_v39 = vld [vmem:[#allocation4] sm:$0xff] }
 0x20b   : > { %v758_v48 = vpop.xlane.xlu1 %757 }
 0x20c   : > { %v762_v49 = vmax.f32 %v745_v45, %v758_v48  ;;  %v769_v11 = vmul.f32 1.442695, %v764_v46 }
 0x20e   : > { %787 = vperm.xlu1 %1588, %v761_v44   ;;  %v766_v50 = vsub.f32 %v745_v45, %v762_v49  ;;  %1167 = vst.msk [vmem:[#allocation2 + $0x18] sm:$0xff] %vm403_vm2, %v762_v49 }
 0x210   : > { %v773_v14 = vmul.f32 1.442695, %v766_v50 }
 0x212   : > { %792 = vperm.xlu1 %1588, %v762_v49   ;;  %v1130_v49 = vld [vmem:[#allocation4 + $0x10] sm:$0xff] }
 0x285   : > { %v778_v53 = vpop.permute.xlu0 %777 }
 0x286   : > { %v795_v54 = vsub.f32 %v511_v18, %v778_v53 }
 0x288   : > { %v799_v55 = vmul.f32 1.442695, %v795_v54  ;;  %v1131_v54 = vld [vmem:[#allocation4 + $0x18] sm:$0xff] }
 0x289   : > { %v783_v56 = vpop.permute.xlu1 %782 }
 0x28a   : > { %1589 = vpow2.f32 %v799_v55  ;;  %v796_v57 = vsub.f32 %v587_v20, %v783_v56 }
 0x28c   : > { %v801_v58 = vmul.f32 1.442695, %v796_v57 }
 0x28d   : > { %v788_v59 = vpop.permute.xlu1 %787 }
 0x28e   : > { %1591 = vpow2.f32 %v801_v58  ;;  %v797_v60 = vsub.f32 %v663_v26, %v788_v59  ;;  %v809_v26 = vld [vmem:[#allocation3 + $0x10] sm:$0xff] }
 0x290   : > { %v803_v61 = vmul.f32 1.442695, %v797_v60 }
 0x291   : > { %v793_v62 = vpop.permute.xlu1 %792 }
 0x292   : > { %1593 = vpow2.f32 %v803_v61  ;;  %v798_v63 = vsub.f32 %v739_v30, %v793_v62  ;;  %v810_v30 = vld [vmem:[#allocation3 + $0x18] sm:$0xff] }
 0x294   : > { %v1590_v2 = vpop.eup %1589  ;;  %v805_v3 = vmul.f32 1.442695, %v798_v63 }
 0x295   : > { %1485 = vmatmul.mubr.msk.f32.vlgmr.msra.gmra.mrb[4].mxu0 %vm746_vm3, %v1590_v2  ;;  %v815_v4 = vsel %vm746_vm3, %v1590_v2, 0.0 }
 0x296   : > { %1595 = vpow2.f32 %v805_v3  ;;  %816 = vadd.xlane.f32.xlu1 %v815_v4  ;;  %1493 = vmatpush3.msra.mxu0 %v431_v1 }
 0x297   : > { %1494 = vmatprep.mubr.msk.f32.mxu0 %vm1832_vm1, %v1831_v0  ;;  %1597 = vpow2.f32 %v769_v11 }
 0x298   : > { %v1592_v6 = vpop.eup %1591  ;;  %1599 = vpow2.f32 %v767_v13 }
 0x299   : > { %1490 = vmatmul.mubr.msk.f32.vlgmr.msra.gmra.mrb[4].mxu1 %vm746_vm3, %v1592_v6  ;;  %v818_v7 = vsel %vm746_vm3, %v1592_v6, 0.0 }
 0x29a   : > { %819 = vadd.xlane.f32.xlu0 %v818_v7  ;;  %1498 = vmatpush3.msra.mxu1 %v432_v5 }
 0x29b   : > { %1499 = vmatprep.mubr.msk.f32.mxu1 %vm1832_vm1, %v1831_v0  ;;  %v771_v0 = vmul.f32 1.442695, %v765_v47 }
 0x29c   : > { %v1594_v8 = vpop.eup %1593 }
 0x29d   : > { %1495 = vmatmul.mubr.msk.f32.vlgmr.msra.gmra.mrb[6].mxu0 %vm746_vm3, %v1594_v8  ;;  %v821_v9 = vsel %vm746_vm3, %v1594_v8, 0.0  ;;  %1601 = vpow2.f32 %v771_v0 }
 0x29e   : > { %822 = vadd.xlane.f32.xlu1 %v821_v9  ;;  %1603 = vpow2.f32 %v773_v14 }
 0x2a0   : > { %v1596_v10 = vpop.eup %1595 }
 0x2a1   : > { %1500 = vmatmul.mubr.msk.f32.vlgmr.msra.gmra.mrb[6].mxu1 %vm746_vm3, %v1596_v10  ;;  %v824_v12 = vsel %vm746_vm3, %v1596_v10, 0.0  ;;  %v1598_v15 = vpop.eup %1597 }
 0x2a2   : > { %825 = vadd.xlane.f32.xlu1 %v824_v12  ;;  %v1600_v16 = vpop.eup %1599  ;;  %v812_v24 = vmul.f32 %v1598_v15, %v808_v22 }
 0x2a3   : > { %v811_v20 = vmul.f32 %v1600_v16, %v807_v19 }
 0x2a7   : > { %v1602_v17 = vpop.eup %1601 }
 0x2a8   : > { %v1604_v18 = vpop.eup %1603  ;;  %v813_v28 = vmul.f32 %v1602_v17, %v809_v26 }
 0x2a9   : > { %v814_v33 = vmul.f32 %v1604_v18, %v810_v30 }
 0x2b0   : > { %1139 = vperm.xlu0 %1587, %v1598_v15  }
 0x2b3   : > { %1134 = vperm.xlu1 %1588, %v1600_v16  }
 0x2b7   : > { %1144 = vperm.xlu1 %1588, %v1602_v17  }
 0x2bb   : > { %1149 = vperm.xlu1 %1588, %v1604_v18  }
 0x323   : > { %v817_v21 = vpop.xlane.xlu1 %816 }
 0x324   : > { %v827_v23 = vadd.f32 %v817_v21, %v811_v20 }
 0x326   : > { %832 = vst.msk [vmem:[#allocation3] sm:$0xff] %vm403_vm2, %v827_v23 }
 0x327   : > { %v820_v25 = vpop.xlane.xlu0 %819 }
 0x328   : > { %v828_v27 = vadd.f32 %v820_v25, %v812_v24 }
 0x32a   : > { %833 = vst.msk [vmem:[#allocation3 + $0x8] sm:$0xff] %vm403_vm2, %v828_v27 }
 0x32b   : > { %v823_v29 = vpop.xlane.xlu1 %822 }
 0x32c   : > { %v829_v31 = vadd.f32 %v823_v29, %v813_v28 }
 0x32d   : > { %v1175_v32 = vld [vmem:[#allocation3] sm:$0xff] }
 0x32e   : > { %834 = vst.msk [vmem:[#allocation3 + $0x10] sm:$0xff] %vm403_vm2, %v829_v31  ;;  %1181 = vperm.xlu1 %1588, %v1175_v32  }
 0x32f   : > { %v826_v34 = vpop.xlane.xlu1 %825  ;;  %v1140_v43 = vpop.permute.xlu0 %1139 }
 0x330   : > { %v830_v35 = vadd.f32 %v826_v34, %v814_v33  ;;  %v1153_v48 = vmul.f32 %v1140_v43, %v1129_v42 }
 0x331   : > { %v1176_v36 = vld [vmem:[#allocation3 + $0x8] sm:$0xff] }
 0x332   : > { %835 = vst.msk [vmem:[#allocation3 + $0x18] sm:$0xff] %vm403_vm2, %v830_v35  ;;  %1186 = vperm.xlu0 %1587, %v1176_v36  }
 0x333   : > { %v1135_v40 = vpop.permute.xlu1 %1134 }
 0x334   : > { %v1152_v41 = vmul.f32 %v1135_v40, %v1128_v39 }
 0x335   : > { %v1177_v37 = vld [vmem:[#allocation3 + $0x10] sm:$0xff] }
 0x336   : > { %1191 = vperm.xlu1 %1588, %v1177_v37  }
 0x337   : > { %v1145_v47 = vpop.permute.xlu1 %1144 }
 0x338   : > { %v1154_v53 = vmul.f32 %v1145_v47, %v1130_v49 }
 0x339   : > { %v1178_v38 = vld [vmem:[#allocation3 + $0x18] sm:$0xff] }
 0x33a   : > { %1196 = vperm.xlu0 %1587, %v1178_v38  }
 0x33b   : > { %v1150_v55 = vpop.permute.xlu1 %1149 }
 0x33c   : > { %v1155_v59 = vmul.f32 %v1150_v55, %v1131_v54 }
 0x368   : > { %v905_v44 = vpop.f32.mrb[4].mxu0 }
 0x369   : > { %v1156_v45 = vadd.f32 %v1152_v41, %v905_v44  ;;  %v1486_v46 = vpop.f32.mrb[5].mxu0 }
 0x36b   : > { %1160 = vst.msk [vmem:[#allocation4] sm:$0xff] %vm412_vm0, %v1156_v45 }
 0x36c   : > { %v978_v50 = vpop.f32.mrb[4].mxu1 }
 0x36d   : > { %v1157_v51 = vadd.f32 %v1153_v48, %v978_v50  ;;  %v1491_v52 = vpop.f32.mrb[5].mxu1 }
 0x36f   : > { %1161 = vst.msk [vmem:[#allocation4 + $0x8] sm:$0xff] %vm412_vm0, %v1157_v51 }
 0x370   : > { %v1051_v56 = vpop.f32.mrb[6].mxu0 }
 0x371   : > { %v1158_v57 = vadd.f32 %v1154_v53, %v1051_v56  ;;  %v1496_v58 = vpop.f32.mrb[7].mxu0 }
 0x372   : > { %v1171_v4 = vld [vmem:[#allocation4] sm:$0xff] }
 0x373   : > { %1162 = vst.msk [vmem:[#allocation4 + $0x10] sm:$0xff] %vm412_vm0, %v1158_v57 }
 0x374   : > { %v1124_v60 = vpop.f32.mrb[6].mxu1 }
 0x375   : > { %v1159_v61 = vadd.f32 %v1155_v59, %v1124_v60  ;;  %v1501_v62 = vpop.f32.mrb[7].mxu1 }
 0x376   : > { %v1172_v8 = vld [vmem:[#allocation4 + $0x8] sm:$0xff] }
 0x377   : > { %1163 = vst.msk [vmem:[#allocation4 + $0x18] sm:$0xff] %vm412_vm0, %v1159_v61 }
 0x37a   : > { %v1173_v11 = vld [vmem:[#allocation4 + $0x10] sm:$0xff] }
 0x37e   : > { %v1174_v0 = vld [vmem:[#allocation4 + $0x18] sm:$0xff] }
 0x3ad   : > { %v1182_v63 = vpop.permute.xlu1 %1181 }
 0x3ae   : > { %1605 = vrcp.f32 %v1182_v63 }
 0x3b1   : > { %v1187_v1 = vpop.permute.xlu0 %1186 }
 0x3b2   : > { %1607 = vrcp.f32 %v1187_v1 }
 0x3b5   : > { %v1192_v2 = vpop.permute.xlu1 %1191 }
 0x3b6   : > { %1609 = vrcp.f32 %v1192_v2 }
 0x3b8   : > { %v1606_v3 = vpop.eup %1605 }
 0x3b9   : > { %v1200_v5 = vmul.f32 %v1606_v3, %v1171_v4  ;;  %v1197_v6 = vpop.permute.xlu0 %1196 }
 0x3ba   : > { %1611 = vrcp.f32 %v1197_v6 }
 0x3bb   : > { %1207 = vst.msk [vmem:[%s393_s21] sm:$0xff] %vm412_vm0, %v1200_v5 }
 0x3bc   : > { %v1608_v7 = vpop.eup %1607 }
 0x3bd   : > { %v1202_v9 = vmul.f32 %v1608_v7, %v1172_v8 }
 0x3bf   : > { %1208 = vst.msk [vmem:[%s393_s21 + $0x8] sm:$0xff] %vm412_vm0, %v1202_v9 }
 0x3c0   : > { %v1610_v10 = vpop.eup %1609 }
 0x3c1   : > { %v1204_v12 = vmul.f32 %v1610_v10, %v1173_v11 }
 0x3c3   : > { %1209 = vst.msk [vmem:[%s393_s21 + $0x10] sm:$0xff] %vm412_vm0, %v1204_v12 }
 0x3c4   : > { %v1612_v13 = vpop.eup %1611 }
 0x3c5   : > { %v1206_v14 = vmul.f32 %v1612_v13, %v1174_v0 }
 0x3c7   : > { %1210 = vst.msk [vmem:[%s393_s21 + $0x18] sm:$0xff] %vm412_vm0, %v1206_v14 }
 0x3c8   : > { %1746 = shalt.err (!%p1743_p7)
}
 0x3c9   : > { %s1747_s10 = scalar_lea.hbm %s2256_s24, 512  ;;  %s1751_s26 = scalar_lea.hbm %s2312_s4, 1024 }
 0x3ca   : > { %p1748_p3 = scmp.ne.s32.totalorder %s2256_s24, %s1747_s10  ;;  %p1752_p12 = scmp.lt.u32.totalorder %s2256_s24, %s2312_s4 }
 0x3cb   : > { %p1753_p4 = scmp.lt.u32.totalorder %s1751_s26, %s1747_s10  ;;  %p1755_p0 = scmp.lt.u32.totalorder %s1747_s10, %s2256_s24 }
 0x3cc   : > { %p1749_p10 = pnand %p1748_p3, %p2346_p1 }
 0x3cd   : > { %p1754_p8 = por %p1753_p4, %p1752_p12 }
 0x3ce   : > { %p1750_p9 = pneg %p1749_p10 }
 0x3cf   : > { %p1756_p6 = por %p1755_p0, %p1754_p8 }
 0x3d1   : > { %p1757_p13 = pnand %p1756_p6, %p1750_p9 }
 0x3d3   : > { %1760 = shalt.err (!%p1757_p13)
}
 0x3d4   : > { %s1836_s5 = smov 128   ;;  %s1837_s13 = smov 8  }
 0x3d5   : > { %1510 = dma.vmem_to_hbm [thread:$0]  (%p2346_p1), %s2258_s17, 512, %s2256_s24, %s1212_s9, %s1836_s5, %s1836_s5, %s1837_s13  }
 0x3d6 PF: > { %s2347_s19 = sld [smem:[#allocation20_spill]]  ;;  %s1243_s20 = sand.u32 1, %s1803_s15  }
 0x3d7   : > { %p2348_p11 = scmp.ne.s32.totalorder %s2334_s30, 0  ;;  %s1244_s23 = scalar_lea.sflag [#allocation7], %s1243_s20 }
 0x3dc   : > { %p2349_p2 = scmp.ge.s32.totalorder %s2347_s19, 2 }
 0x3de   : > { %p1526_p5 = pnand %p2349_p2, %p2348_p11 }
 0x3e0   : > { %1798 = dma.done.wait (!%p1526_p5), %s1244_s23, 512  }
 0x3e1   : > { %1800 = vsyncadd (!%p1526_p5), %s1244_s23, 4294966784  ;;  %s26_s20 = sadd.s32 1, %s2347_s19   ;;  %s2350_s14 = sld [smem:[#allocation18_spill]] }
 0x3e2   : > { %p23_p7 = scmp.ge.s32.totalorder %s26_s20, 4   ;;  %s2351_s17 = sld [smem:[#allocation22_spill]] }
 0x3e3   : > { %s2352_s18 = sld [smem:[#allocation19_spill]]  ;;  %s2353_s19 = sld [smem:[#allocation21_spill]] }
 0x3e4   : > { %s2354_s15 = smov %s1807_s16  ;;  %25 = sbr.rel (!%p23_p7) target bundleno = 13 (0xd), region = 126 }
 0x3e7   : > { %s2355_s16 = smov %s2350_s14 }
 0x3eb   :  { %1249 = vsyncpa [#allocation6], 1 }
 0x3ec   :  { %1251 = vsyncpa [#allocation6 + $0x1], 1 }
 0x3ed   :  { %1252 = vsyncpa [#allocation9], 1 }
 0x3ee   :  { %1254 = vsyncpa [#allocation9 + $0x1], 1 }
 0x3ef   :  { %1255 = vsyncpa [#allocation12], 1 }
 0x3f0   :  { %1257 = vsyncpa [#allocation12 + $0x1], 1 }
 0x3f1   :  { %1258 = vsyncpa [#allocation7], 1 }
 0x3f2   :  { %1260 = vsyncpa [#allocation7 + $0x1], 1 }

</bundles_post_ra>
